<compile_context>
chip_gen: v6e
topology: v6e:2x2x1
jax: 0.10.0
libtpu: 0.0.40
codegen_flags: <defaults>
</compile_context>

<pallas_src>
import functools
import math

import jax
import jax.numpy as jnp
import numpy as np
from jax import lax
from jax.experimental import pallas as pl
from jax.experimental.pallas import tpu as pltpu

# ----- small, module-consistent config -----
N_EMBD = 32
N_HEAD = 1                     # see faithfulness note above
HEAD_SIZE = N_EMBD // N_HEAD
BATCH = 2
SEQ = 8                        # <= block_size; causal tril mask built in-kernel
LN_EPS = 1e-5

# Row layout of the packed per-channel-vector operand (one (8, 4C) f32 vreg).
_ROW_LN1_G, _ROW_LN1_B, _ROW_PROJ_B, _ROW_LN2_G, _ROW_LN2_B, _ROW_FF_B2, _ROW_FF_B1 = range(7)


# ----------------------------------------------------------------------------
# Fused Pallas kernel: the entire AttentionBlock forward in one invocation.
# All tensors are tiny (< 100 KB total) so everything stays resident in VMEM.
# ----------------------------------------------------------------------------
def _attention_block_kernel(
    x_ref,        # (B*T, C)   input, flattened
    wqkv_ref,     # (C, 3*hs)  packed [Wq | Wk | Wv]
    proj_w_ref,   # (hs, C)
    ff_w1_ref,    # (C, 4C)
    ff_w2_ref,    # (4C, C)
    vecs_ref,     # (8, 4C)    packed per-channel vectors (see _ROW_* layout)
    o_ref,        # (B*T, C)
    *, B, T,
):
    C = x_ref.shape[1]
    hs = wqkv_ref.shape[1] // 3

    x = x_ref[...].astype(jnp.float32)                        # (B*T, C)
    vec = vecs_ref[...]                                       # (8, 4C) one vreg

    ln1_g = vec[_ROW_LN1_G:_ROW_LN1_G + 1, :C]
    ln1_b = vec[_ROW_LN1_B:_ROW_LN1_B + 1, :C]
    proj_b = vec[_ROW_PROJ_B:_ROW_PROJ_B + 1, :C]
    ln2_g = vec[_ROW_LN2_G:_ROW_LN2_G + 1, :C]
    ln2_b = vec[_ROW_LN2_B:_ROW_LN2_B + 1, :C]
    ff_b2 = vec[_ROW_FF_B2:_ROW_FF_B2 + 1, :C]
    ff_b1 = vec[_ROW_FF_B1:_ROW_FF_B1 + 1, :]                 # (1, 4C)

    def ln(v, g, b):
        mu = jnp.mean(v, axis=-1, keepdims=True)
        var = jnp.mean((v - mu) ** 2, axis=-1, keepdims=True)
        return (v - mu) * jax.lax.rsqrt(var + LN_EPS) * g + b

    # ---- ln1 ----
    xn1 = ln(x, ln1_g, ln1_b)                                  # (B*T, C)

    # ---- fused QKV projection: one MXU matmul ----
    qkv = jnp.dot(xn1, wqkv_ref[...], preferred_element_type=jnp.float32)  # (B*T, 3*hs)
    q = qkv[:, 0 * hs:1 * hs]
    k = qkv[:, 1 * hs:2 * hs]
    v = qkv[:, 2 * hs:3 * hs]

    # ---- causal mask (tril) ----
    row = jax.lax.broadcasted_iota(jnp.int32, (T, T), 0)
    col = jax.lax.broadcasted_iota(jnp.int32, (T, T), 1)
    causal = col <= row                                        # tril == 1

    # Faithful scale: wx / sqrt(len(k)) where len(k) == B (batch size).
    scale = 1.0 / math.sqrt(B)

    # Per-batch (T,T) scores; B is a tiny static constant -> loop unrolled at trace
    # time, row slices at b*T are sublane-aligned (T == 8).
    s_list = []
    for b in range(B):
        qb = q[b * T:(b + 1) * T, :]                           # (T, hs)
        kb = k[b * T:(b + 1) * T, :]                           # (T, hs)
        sb = lax.dot_general(qb, kb, (((1,), (1,)), ((), ())),
                             preferred_element_type=jnp.float32)   # q @ k^T, (T, T)
        sb = jnp.where(causal, sb, -jnp.inf) * scale           # masked_fill then /sqrt(B)
        s_list.append(sb)

    # Softmax over dim=0 (the BATCH dim) -- faithful to F.softmax(..., dim=0).
    # Fully-masked positions are -inf in every batch element -> NaN (as in PyTorch).
    m = s_list[0]
    for sb in s_list[1:]:
        m = jnp.maximum(m, sb)
    e_list = [jnp.exp(sb - m) for sb in s_list]
    denom = e_list[0]
    for eb in e_list[1:]:
        denom = denom + eb
    inv_denom = 1.0 / denom                                    # NaN propagates faithfully

    # ---- attention output per batch, re-flattened to (B*T, hs) ----
    head_rows = []
    for b in range(B):
        alpha_b = e_list[b] * inv_denom                        # (T, T)
        vb = v[b * T:(b + 1) * T, :]                           # (T, hs)
        head_rows.append(jnp.dot(alpha_b, vb, preferred_element_type=jnp.float32))
    head = jnp.concatenate(head_rows, axis=0)                  # (B*T, hs)

    # ---- output projection + residual (dropout = identity) ----
    x1 = x + jnp.dot(head, proj_w_ref[...],
                     preferred_element_type=jnp.float32) + proj_b

    # ---- ln2 + FFN + residual (dropout = identity) ----
    xn2 = ln(x1, ln2_g, ln2_b)
    h = jnp.dot(xn2, ff_w1_ref[...], preferred_element_type=jnp.float32) + ff_b1
    h = jnp.maximum(h, 0.0)                                    # ReLU
    y = jnp.dot(h, ff_w2_ref[...], preferred_element_type=jnp.float32) + ff_b2

    o_ref[...] = (x1 + y).astype(o_ref.dtype)


# ----------------------------------------------------------------------------
# Wrapper: single pallas_call, single grid step, 6 inputs / 1 output.
# ----------------------------------------------------------------------------
def attention_block_forward(x, params):
    assert N_HEAD == 1, (
        "Reference forward is shape-inconsistent for n_head > 1 "
        "(torch.cat along dim 0 vs Linear(head_size*num_heads, n_embd))."
    )
    B, T, C = x.shape
    hs = HEAD_SIZE
    H4 = params["ff_w1"].shape[1]                              # 4*C (== 128, one lane width)

    wq, wk, wv = params["heads"][0]
    wqkv = jnp.concatenate([wq, wk, wv], axis=1)               # (C, 3*hs)

    # Pack all per-channel vectors into one vreg-sized (8, 4C) operand.
    vecs = jnp.zeros((8, H4), jnp.float32)
    vecs = vecs.at[_ROW_LN1_G, :C].set(params["ln1_g"])
    vecs = vecs.at[_ROW_LN1_B, :C].set(params["ln1_b"])
    vecs = vecs.at[_ROW_PROJ_B, :C].set(params["proj_b"])
    vecs = vecs.at[_ROW_LN2_G, :C].set(params["ln2_g"])
    vecs = vecs.at[_ROW_LN2_B, :C].set(params["ln2_b"])
    vecs = vecs.at[_ROW_FF_B2, :C].set(params["ff_b2"])
    vecs = vecs.at[_ROW_FF_B1, :].set(params["ff_b1"])

    x2d = x.reshape(B * T, C)

    full = lambda shape: pl.BlockSpec(shape, lambda i: (0,) * len(shape))

    kernel = functools.partial(_attention_block_kernel, B=B, T=T)

    out2d = pl.pallas_call(
        kernel,
        out_shape=jax.ShapeDtypeStruct((B * T, C), x.dtype),
        grid=(1,),
        in_specs=[
            full((B * T, C)),                 # x (flattened)
            full((C, 3 * hs)),                # packed QKV weight
            full((hs, C)),                    # proj weight
            full((C, H4)),                    # ffn w1
            full((H4, C)),                    # ffn w2
            full((8, H4)),                    # packed per-channel vectors
        ],
        out_specs=full((B * T, C)),
        compiler_params=pltpu.CompilerParams(dimension_semantics=("arbitrary",)),
    )(x2d, wqkv, params["proj_w"], params["ff_w1"], params["ff_w2"], vecs)
    return out2d.reshape(B, T, C)


# ----------------------------------------------------------------------------
# Pure-JAX reference (same math, no Pallas) for validation
# ----------------------------------------------------------------------------
def ref_forward(x, params):
    def ln(v, g, b):
        mu = v.mean(-1, keepdims=True)
        var = ((v - mu) ** 2).mean(-1, keepdims=True)
        return (v - mu) / jnp.sqrt(var + LN_EPS) * g + b

    B, T, _ = x.shape
    tril = jnp.tril(jnp.ones((T, T), jnp.float32))
    xn1 = ln(x, params["ln1_g"], params["ln1_b"])
    heads = []
    for (wq, wk, wv) in params["heads"]:
        q, k, v = xn1 @ wq, xn1 @ wk, xn1 @ wv
        s = jnp.einsum("btd,bsd->bts", q, k)
        s = jnp.where(tril[None] == 0, -jnp.inf, s)
        alpha = jax.nn.softmax(s / math.sqrt(B), axis=0)       # softmax over batch dim
        heads.append(jnp.einsum("bts,bsd->btd", alpha, v))
    cat = jnp.concatenate(heads, axis=0)
    x = x + (cat @ params["proj_w"] + params["proj_b"])
    xn2 = ln(x, params["ln2_g"], params["ln2_b"])
    h = jnp.maximum(xn2 @ params["ff_w1"] + params["ff_b1"], 0.0)
    return x + (h @ params["ff_w2"] + params["ff_b2"])


# ----------------------------------------------------------------------------
def init_params(key):
    # Linear weights stored pre-transposed as (in_features, out_features) so kernels
    # compute x @ W directly (PyTorch stores (out, in) and does x @ W.T).
    ks = jax.random.split(key, 8)
    scale = 0.02
    heads = []
    for h in range(N_HEAD):
        kq, kk, kv = jax.random.split(ks[h], 3)
        heads.append((
            scale * jax.random.normal(kq, (N_EMBD, HEAD_SIZE), jnp.float32),
            scale * jax.random.normal(kk, (N_EMBD, HEAD_SIZE), jnp.float32),
            scale * jax.random.normal(kv, (N_EMBD, HEAD_SIZE), jnp.float32),
        ))
    return {
        "heads": heads,
        "proj_w": scale * jax.random.normal(ks[6], (HEAD_SIZE * N_HEAD, N_EMBD), jnp.float32),
        "proj_b": jnp.zeros((N_EMBD,), jnp.float32),
        "ff_w1": scale * jax.random.normal(ks[7], (N_EMBD, 4 * N_EMBD), jnp.float32),
        "ff_b1": jnp.zeros((4 * N_EMBD,), jnp.float32),
        "ff_w2": scale * jax.random.normal(jax.random.fold_in(ks[7], 1),
                                           (4 * N_EMBD, N_EMBD), jnp.float32),
        "ff_b2": jnp.zeros((N_EMBD,), jnp.float32),
        "ln1_g": jnp.ones((N_EMBD,), jnp.float32),
        "ln1_b": jnp.zeros((N_EMBD,), jnp.float32),
        "ln2_g": jnp.ones((N_EMBD,), jnp.float32),
        "ln2_b": jnp.zeros((N_EMBD,), jnp.float32),
    }


if __name__ == "__main__":
    key = jax.random.PRNGKey(0)
    k_x, k_p = jax.random.split(key)
    x = jax.random.normal(k_x, (BATCH, SEQ, N_EMBD), jnp.float32)
    params = init_params(k_p)

    out = jax.jit(attention_block_forward)(x, params)
    out = jax.block_until_ready(out)

    ref = jax.block_until_ready(ref_forward(x, params))
    assert out.shape == (BATCH, SEQ, N_EMBD)
    # NaNs are expected at fully-masked positions (batch-dim softmax of all -inf),
    # exactly as in the PyTorch reference; assert_allclose treats NaN==NaN by default.
    np.testing.assert_allclose(np.asarray(out), np.asarray(ref), rtol=1e-4, atol=1e-4)

    print("KERNEL_OK")
</pallas_src>

<mosaic_0001>
module attributes {stable_mosaic.version = 11 : i64} {
  func.func @_attention_block_kernel(%arg0: i32, %arg1: memref<16x32xf32, #tpu.memory_space<vmem>>, %arg2: memref<32x96xf32, #tpu.memory_space<vmem>>, %arg3: memref<32x32xf32, #tpu.memory_space<vmem>>, %arg4: memref<32x128xf32, #tpu.memory_space<vmem>>, %arg5: memref<128x32xf32, #tpu.memory_space<vmem>>, %arg6: memref<8x128xf32, #tpu.memory_space<vmem>>, %arg7: memref<16x32xf32, #tpu.memory_space<vmem>>) attributes {dimension_semantics = [#tpu.dimension_semantics<arbitrary>], iteration_bounds = array<i64: 1>, scalar_prefetch = 0 : i64, scratch_operands = 0 : i64, tpu.core_type = #tpu.core_type<tc>, window_params = [{pipeline_mode = #tpu.pipeline_mode<synchronous>, transform_indices = @transform_0, window_bounds = array<i64: 16, 32>}, {pipeline_mode = #tpu.pipeline_mode<synchronous>, transform_indices = @transform_1, window_bounds = array<i64: 32, 96>}, {pipeline_mode = #tpu.pipeline_mode<synchronous>, transform_indices = @transform_2, window_bounds = array<i64: 32, 32>}, {pipeline_mode = #tpu.pipeline_mode<synchronous>, transform_indices = @transform_3, window_bounds = array<i64: 32, 128>}, {pipeline_mode = #tpu.pipeline_mode<synchronous>, transform_indices = @transform_4, window_bounds = array<i64: 128, 32>}, {pipeline_mode = #tpu.pipeline_mode<synchronous>, transform_indices = @transform_5, window_bounds = array<i64: 8, 128>}, {pipeline_mode = #tpu.pipeline_mode<synchronous>, transform_indices = @transform_6, window_bounds = array<i64: 16, 32>}]} {
    %c0 = arith.constant 0 : index
    %c0_0 = arith.constant 0 : index
    %0 = vector.load %arg1[%c0, %c0_0] : memref<16x32xf32, #tpu.memory_space<vmem>>, vector<16x32xf32>
    %c0_1 = arith.constant 0 : index
    %c0_2 = arith.constant 0 : index
    %1 = vector.load %arg6[%c0_1, %c0_2] : memref<8x128xf32, #tpu.memory_space<vmem>>, vector<8x128xf32>
    %2 = vector.extract_strided_slice %1 {offsets = [0, 0], sizes = [1, 32], strides = [1, 1]} : vector<8x128xf32> to vector<1x32xf32>
    %3 = vector.extract_strided_slice %1 {offsets = [1, 0], sizes = [1, 32], strides = [1, 1]} : vector<8x128xf32> to vector<1x32xf32>
    %4 = vector.extract_strided_slice %1 {offsets = [2, 0], sizes = [1, 32], strides = [1, 1]} : vector<8x128xf32> to vector<1x32xf32>
    %5 = vector.extract_strided_slice %1 {offsets = [3, 0], sizes = [1, 32], strides = [1, 1]} : vector<8x128xf32> to vector<1x32xf32>
    %6 = vector.extract_strided_slice %1 {offsets = [4, 0], sizes = [1, 32], strides = [1, 1]} : vector<8x128xf32> to vector<1x32xf32>
    %7 = vector.extract_strided_slice %1 {offsets = [5, 0], sizes = [1, 32], strides = [1, 1]} : vector<8x128xf32> to vector<1x32xf32>
    %8 = vector.extract_strided_slice %1 {offsets = [6, 0], sizes = [1, 128], strides = [1, 1]} : vector<8x128xf32> to vector<1x128xf32>
    %cst = arith.constant dense<0.000000e+00> : vector<16xf32>
    %9 = vector.multi_reduction <add>, %0, %cst [1] : vector<16x32xf32> to vector<16xf32>
    %10 = vector.shape_cast %9 : vector<16xf32> to vector<16x1xf32>
    %cst_3 = arith.constant 3.200000e+01 : f32
    %11 = vector.broadcast %cst_3 : f32 to vector<16x1xf32>
    %12 = arith.divf %10, %11 : vector<16x1xf32>
    %13 = vector.broadcast %12 : vector<16x1xf32> to vector<16x32xf32>
    %14 = arith.subf %0, %13 : vector<16x32xf32>
    %15 = arith.mulf %14, %14 : vector<16x32xf32>
    %cst_4 = arith.constant dense<0.000000e+00> : vector<16xf32>
    %16 = vector.multi_reduction <add>, %15, %cst_4 [1] : vector<16x32xf32> to vector<16xf32>
    %17 = vector.shape_cast %16 : vector<16xf32> to vector<16x1xf32>
    %cst_5 = arith.constant 3.200000e+01 : f32
    %18 = vector.broadcast %cst_5 : f32 to vector<16x1xf32>
    %19 = arith.divf %17, %18 : vector<16x1xf32>
    %20 = vector.broadcast %12 : vector<16x1xf32> to vector<16x32xf32>
    %21 = arith.subf %0, %20 : vector<16x32xf32>
    %cst_6 = arith.constant 9.99999974E-6 : f32
    %22 = vector.broadcast %cst_6 : f32 to vector<16x1xf32>
    %23 = arith.addf %19, %22 : vector<16x1xf32>
    %24 = math.rsqrt %23 : vector<16x1xf32>
    %25 = vector.broadcast %24 : vector<16x1xf32> to vector<16x32xf32>
    %26 = arith.mulf %21, %25 : vector<16x32xf32>
    %27 = vector.broadcast %2 : vector<1x32xf32> to vector<16x32xf32>
    %28 = arith.mulf %26, %27 : vector<16x32xf32>
    %29 = vector.broadcast %3 : vector<1x32xf32> to vector<16x32xf32>
    %30 = arith.addf %28, %29 : vector<16x32xf32>
    %c0_7 = arith.constant 0 : index
    %c0_8 = arith.constant 0 : index
    %31 = vector.load %arg2[%c0_7, %c0_8] : memref<32x96xf32, #tpu.memory_space<vmem>>, vector<32x96xf32>
    %cst_9 = arith.constant dense<0.000000e+00> : vector<16x96xf32>
    %32 = tpu.matmul %30, %31, %cst_9 {dimension_numbers = #tpu.dot_dimension_numbers<[1], [0], [0], [1], [0, 0, 1, 1], [], []>} : vector<16x32xf32>, vector<32x96xf32>, vector<16x96xf32> -> vector<16x96xf32>
    %33 = vector.extract_strided_slice %32 {offsets = [0, 0], sizes = [16, 32], strides = [1, 1]} : vector<16x96xf32> to vector<16x32xf32>
    %34 = vector.extract_strided_slice %32 {offsets = [0, 32], sizes = [16, 32], strides = [1, 1]} : vector<16x96xf32> to vector<16x32xf32>
    %35 = vector.extract_strided_slice %32 {offsets = [0, 64], sizes = [16, 32], strides = [1, 1]} : vector<16x96xf32> to vector<16x32xf32>
    %36 = tpu.iota {dimensions = array<i32: 0>} : vector<8x8xi32>
    %37 = tpu.iota {dimensions = array<i32: 1>} : vector<8x8xi32>
    %38 = arith.cmpi sle, %37, %36 : vector<8x8xi32>
    %39 = vector.extract_strided_slice %33 {offsets = [0, 0], sizes = [8, 32], strides = [1, 1]} : vector<16x32xf32> to vector<8x32xf32>
    %40 = vector.extract_strided_slice %34 {offsets = [0, 0], sizes = [8, 32], strides = [1, 1]} : vector<16x32xf32> to vector<8x32xf32>
    %cst_10 = arith.constant dense<0.000000e+00> : vector<8x8xf32>
    %41 = tpu.matmul %39, %40, %cst_10 {dimension_numbers = #tpu.dot_dimension_numbers<[1], [1], [0], [0], [0, 0, 1, 0], [], []>} : vector<8x32xf32>, vector<8x32xf32>, vector<8x8xf32> -> vector<8x8xf32>
    %cst_11 = arith.constant 0xFF800000 : f32
    %42 = vector.broadcast %cst_11 : f32 to vector<8x8xf32>
    %43 = arith.select %38, %41, %42 : vector<8x8xi1>, vector<8x8xf32>
    %cst_12 = arith.constant 0.707106769 : f32
    %44 = vector.broadcast %cst_12 : f32 to vector<8x8xf32>
    %45 = arith.mulf %43, %44 : vector<8x8xf32>
    %46 = vector.extract_strided_slice %33 {offsets = [8, 0], sizes = [8, 32], strides = [1, 1]} : vector<16x32xf32> to vector<8x32xf32>
    %47 = vector.extract_strided_slice %34 {offsets = [8, 0], sizes = [8, 32], strides = [1, 1]} : vector<16x32xf32> to vector<8x32xf32>
    %cst_13 = arith.constant dense<0.000000e+00> : vector<8x8xf32>
    %48 = tpu.matmul %46, %47, %cst_13 {dimension_numbers = #tpu.dot_dimension_numbers<[1], [1], [0], [0], [0, 0, 1, 0], [], []>} : vector<8x32xf32>, vector<8x32xf32>, vector<8x8xf32> -> vector<8x8xf32>
    %cst_14 = arith.constant 0xFF800000 : f32
    %49 = vector.broadcast %cst_14 : f32 to vector<8x8xf32>
    %50 = arith.select %38, %48, %49 : vector<8x8xi1>, vector<8x8xf32>
    %cst_15 = arith.constant 0.707106769 : f32
    %51 = vector.broadcast %cst_15 : f32 to vector<8x8xf32>
    %52 = arith.mulf %50, %51 : vector<8x8xf32>
    %53 = arith.maximumf %45, %52 : vector<8x8xf32>
    %54 = arith.subf %45, %53 : vector<8x8xf32>
    %55 = math.exp %54 : vector<8x8xf32>
    %56 = arith.subf %52, %53 : vector<8x8xf32>
    %57 = math.exp %56 : vector<8x8xf32>
    %58 = arith.addf %55, %57 : vector<8x8xf32>
    %cst_16 = arith.constant 1.000000e+00 : f32
    %59 = vector.broadcast %cst_16 : f32 to vector<8x8xf32>
    %60 = arith.divf %59, %58 : vector<8x8xf32>
    %61 = arith.mulf %55, %60 : vector<8x8xf32>
    %62 = vector.extract_strided_slice %35 {offsets = [0, 0], sizes = [8, 32], strides = [1, 1]} : vector<16x32xf32> to vector<8x32xf32>
    %cst_17 = arith.constant dense<0.000000e+00> : vector<8x32xf32>
    %63 = tpu.matmul %61, %62, %cst_17 {dimension_numbers = #tpu.dot_dimension_numbers<[1], [0], [0], [1], [0, 0, 1, 1], [], []>} : vector<8x8xf32>, vector<8x32xf32>, vector<8x32xf32> -> vector<8x32xf32>
    %64 = arith.mulf %57, %60 : vector<8x8xf32>
    %65 = vector.extract_strided_slice %35 {offsets = [8, 0], sizes = [8, 32], strides = [1, 1]} : vector<16x32xf32> to vector<8x32xf32>
    %cst_18 = arith.constant dense<0.000000e+00> : vector<8x32xf32>
    %66 = tpu.matmul %64, %65, %cst_18 {dimension_numbers = #tpu.dot_dimension_numbers<[1], [0], [0], [1], [0, 0, 1, 1], [], []>} : vector<8x8xf32>, vector<8x32xf32>, vector<8x32xf32> -> vector<8x32xf32>
    %67 = tpu.concatenate %63, %66 in 0 : vector<8x32xf32>, vector<8x32xf32> -> vector<16x32xf32>
    %c0_19 = arith.constant 0 : index
    %c0_20 = arith.constant 0 : index
    %68 = vector.load %arg3[%c0_19, %c0_20] : memref<32x32xf32, #tpu.memory_space<vmem>>, vector<32x32xf32>
    %cst_21 = arith.constant dense<0.000000e+00> : vector<16x32xf32>
    %69 = tpu.matmul %67, %68, %cst_21 {dimension_numbers = #tpu.dot_dimension_numbers<[1], [0], [0], [1], [0, 0, 1, 1], [], []>} : vector<16x32xf32>, vector<32x32xf32>, vector<16x32xf32> -> vector<16x32xf32>
    %70 = arith.addf %0, %69 : vector<16x32xf32>
    %71 = vector.broadcast %4 : vector<1x32xf32> to vector<16x32xf32>
    %72 = arith.addf %70, %71 : vector<16x32xf32>
    %cst_22 = arith.constant dense<0.000000e+00> : vector<16xf32>
    %73 = vector.multi_reduction <add>, %72, %cst_22 [1] : vector<16x32xf32> to vector<16xf32>
    %74 = vector.shape_cast %73 : vector<16xf32> to vector<16x1xf32>
    %cst_23 = arith.constant 3.200000e+01 : f32
    %75 = vector.broadcast %cst_23 : f32 to vector<16x1xf32>
    %76 = arith.divf %74, %75 : vector<16x1xf32>
    %77 = vector.broadcast %76 : vector<16x1xf32> to vector<16x32xf32>
    %78 = arith.subf %72, %77 : vector<16x32xf32>
    %79 = arith.mulf %78, %78 : vector<16x32xf32>
    %cst_24 = arith.constant dense<0.000000e+00> : vector<16xf32>
    %80 = vector.multi_reduction <add>, %79, %cst_24 [1] : vector<16x32xf32> to vector<16xf32>
    %81 = vector.shape_cast %80 : vector<16xf32> to vector<16x1xf32>
    %cst_25 = arith.constant 3.200000e+01 : f32
    %82 = vector.broadcast %cst_25 : f32 to vector<16x1xf32>
    %83 = arith.divf %81, %82 : vector<16x1xf32>
    %84 = vector.broadcast %76 : vector<16x1xf32> to vector<16x32xf32>
    %85 = arith.subf %72, %84 : vector<16x32xf32>
    %cst_26 = arith.constant 9.99999974E-6 : f32
    %86 = vector.broadcast %cst_26 : f32 to vector<16x1xf32>
    %87 = arith.addf %83, %86 : vector<16x1xf32>
    %88 = math.rsqrt %87 : vector<16x1xf32>
    %89 = vector.broadcast %88 : vector<16x1xf32> to vector<16x32xf32>
    %90 = arith.mulf %85, %89 : vector<16x32xf32>
    %91 = vector.broadcast %5 : vector<1x32xf32> to vector<16x32xf32>
    %92 = arith.mulf %90, %91 : vector<16x32xf32>
    %93 = vector.broadcast %6 : vector<1x32xf32> to vector<16x32xf32>
    %94 = arith.addf %92, %93 : vector<16x32xf32>
    %c0_27 = arith.constant 0 : index
    %c0_28 = arith.constant 0 : index
    %95 = vector.load %arg4[%c0_27, %c0_28] : memref<32x128xf32, #tpu.memory_space<vmem>>, vector<32x128xf32>
    %cst_29 = arith.constant dense<0.000000e+00> : vector<16x128xf32>
    %96 = tpu.matmul %94, %95, %cst_29 {dimension_numbers = #tpu.dot_dimension_numbers<[1], [0], [0], [1], [0, 0, 1, 1], [], []>} : vector<16x32xf32>, vector<32x128xf32>, vector<16x128xf32> -> vector<16x128xf32>
    %97 = vector.broadcast %8 : vector<1x128xf32> to vector<16x128xf32>
    %98 = arith.addf %96, %97 : vector<16x128xf32>
    %cst_30 = arith.constant 0.000000e+00 : f32
    %99 = vector.broadcast %cst_30 : f32 to vector<16x128xf32>
    %100 = arith.maximumf %98, %99 : vector<16x128xf32>
    %c0_31 = arith.constant 0 : index
    %c0_32 = arith.constant 0 : index
    %101 = vector.load %arg5[%c0_31, %c0_32] : memref<128x32xf32, #tpu.memory_space<vmem>>, vector<128x32xf32>
    %cst_33 = arith.constant dense<0.000000e+00> : vector<16x32xf32>
    %102 = tpu.matmul %100, %101, %cst_33 {dimension_numbers = #tpu.dot_dimension_numbers<[1], [0], [0], [1], [0, 0, 1, 1], [], []>} : vector<16x128xf32>, vector<128x32xf32>, vector<16x32xf32> -> vector<16x32xf32>
    %103 = vector.broadcast %7 : vector<1x32xf32> to vector<16x32xf32>
    %104 = arith.addf %102, %103 : vector<16x32xf32>
    %105 = arith.addf %72, %104 : vector<16x32xf32>
    %c0_34 = arith.constant 0 : index
    %c0_35 = arith.constant 0 : index
    %106 = vector.load %arg7[%c0_34, %c0_35] : memref<16x32xf32, #tpu.memory_space<vmem>>, vector<16x32xf32>
    tpu.vector_store %arg7[%c0_34, %c0_35], %105 {strides = array<i32>} : memref<16x32xf32, #tpu.memory_space<vmem>>, vector<16x32xf32>,
    return
  }
  func.func @transform_0(%arg0: i32) -> (i32, i32) {
    %c0_i32 = arith.constant 0 : i32
    %c0_i32_0 = arith.constant 0 : i32
    %c0_i32_1 = arith.constant 0 : i32
    return %c0_i32, %c0_i32_0 : i32, i32
  }
  func.func @transform_1(%arg0: i32) -> (i32, i32) {
    %c0_i32 = arith.constant 0 : i32
    %c0_i32_0 = arith.constant 0 : i32
    %c0_i32_1 = arith.constant 0 : i32
    return %c0_i32, %c0_i32_0 : i32, i32
  }
  func.func @transform_2(%arg0: i32) -> (i32, i32) {
    %c0_i32 = arith.constant 0 : i32
    %c0_i32_0 = arith.constant 0 : i32
    %c0_i32_1 = arith.constant 0 : i32
    return %c0_i32, %c0_i32_0 : i32, i32
  }
  func.func @transform_3(%arg0: i32) -> (i32, i32) {
    %c0_i32 = arith.constant 0 : i32
    %c0_i32_0 = arith.constant 0 : i32
    %c0_i32_1 = arith.constant 0 : i32
    return %c0_i32, %c0_i32_0 : i32, i32
  }
  func.func @transform_4(%arg0: i32) -> (i32, i32) {
    %c0_i32 = arith.constant 0 : i32
    %c0_i32_0 = arith.constant 0 : i32
    %c0_i32_1 = arith.constant 0 : i32
    return %c0_i32, %c0_i32_0 : i32, i32
  }
  func.func @transform_5(%arg0: i32) -> (i32, i32) {
    %c0_i32 = arith.constant 0 : i32
    %c0_i32_0 = arith.constant 0 : i32
    %c0_i32_1 = arith.constant 0 : i32
    return %c0_i32, %c0_i32_0 : i32, i32
  }
  func.func @transform_6(%arg0: i32) -> (i32, i32) {
    %c0_i32 = arith.constant 0 : i32
    %c0_i32_0 = arith.constant 0 : i32
    %c0_i32_1 = arith.constant 0 : i32
    return %c0_i32, %c0_i32_0 : i32, i32
  }
}

</mosaic_0001>

<bundles_post_ra>
// kernel: attention_block_forward.1
= control target key start
LH: loop header
LB: loop body
LE: loop exit
PB: predicated region body
PF: predicated region fallthrough
CT: control target
= control target key end

     0   :  { %vm27_vm0 = vcmask 261120   ;;  %s1215_s0 = inlined_call_operand.vmem [shape: f32[16,32], index: 0, kind: input, shape index: {}]   ;;  %s1216_s1 = inlined_call_operand.vmem [shape: f32[32,96], index: 1, kind: input, shape index: {}]   ;;  %s1217_s2 = inlined_call_operand.vmem [shape: f32[32,32], index: 2, kind: input, shape index: {}]   ;;  %s1218_s3 = inlined_call_operand.vmem [shape: f32[32,128], index: 3, kind: input, shape index: {}]   ;;  %s1219_s4 = inlined_call_operand.vmem [shape: f32[128,32], index: 4, kind: input, shape index: {}]   ;;  %s1220_s5 = inlined_call_operand.vmem [shape: f32[8,128], index: 5, kind: input, shape index: {}]   ;;  %s1221_s6 = inlined_call_operand.hbm [shape: f32[16,32], index: 6, kind: output, shape index: {}]  }
   0x1   :  { %v1049_v0 = vld [vmem:[%s1215_s0] sm:$0xff]  ;;  %v1054_v1 = vld [vmem:[%s1215_s0 + $0x8] sm:$0xff] }
   0x2   :  { %11 = vsyncpa [#allocation3], 0  ;;  %v28_v2 = vsel %vm27_vm0, %v1049_v0, 0.0  ;;  %v31_v3 = vsel %vm27_vm0, %v1054_v1, 0.0  ;;  %v70_v14 = vld [vmem:[%s1216_s1 + $0x18] sm:$0xff]  ;;  %v69_v15 = vld [vmem:[%s1216_s1 + $0x10] sm:$0xff]  ;;  %v55_v23 = vlaneseq }
   0x3   :  { %29 = vadd.xlane.f32.xlu0 %v28_v2  ;;  %873 = vmatprep.subr.mxu1 %v70_v14  ;;  %v68_v16 = vld [vmem:[%s1216_s1 + $0x8] sm:$0xff]  ;;  %v67_v17 = vld [vmem:[%s1216_s1] sm:$0xff]  ;;  %v1004_v39 = vmov 0.0   ;;  %vm1005_vm1 = vmmov 0   ;;  %s1006_s1 = smov 96   ;;  %v483_v46 = vld [vmem:[%s1217_s2 + $0x18] sm:$0xff] }
   0x4   :  { %874 = vmatpush3.msra.mxu1 %v70_v14  ;;  %v1076_v25 = vshrl.u32 %v55_v23, 7  ;;  %v1082_v27 = vld [vmem:[%s1220_s5] sm:$0xff]  ;;  %894 = vmatprep.subr.mxu0 %v1004_v39  ;;  %s1007_s5 = smov 64   ;;  %v155_v47 = vand.u32 127, %v55_v23  ;;  %vm329_vm3 = vcmask 64512  }
   0x5   :  { %875 = vmatprep.subr.mxu1 %v69_v15  ;;  %896 = vmatprep.mubr.msk.f32.mxu0 %vm1005_vm1, %v1004_v39 }
   0x6   :  { %876 = vmatpush3.msra.mxu1 %v69_v15  ;;  %v57_v26 = vsub.s32 0, %v1076_v25  ;;  %v63_v28 = vsub.s32 1, %v1076_v25  ;;  %vm156_vm2 = vcmp.le.s32.totalorder %v155_v47, %v1076_v25  ;;  %v706_v47 = vld [vmem:[%s1219_s4 + $0x20] sm:$0xff] }
   0x7   :  { %32 = vadd.xlane.f32.xlu0 %v31_v3  ;;  %877 = vmatprep.subr.mxu1 %v68_v16 }
   0x8   :  { %878 = vmatpush3.msra.mxu1 %v68_v16  ;;  %v58_v29 = vrot.slane %v1082_v27, %v57_v26  ;;  %v64_v32 = vrot.slane %v1082_v27, %v63_v28 }
   0x9   :  { %879 = vmatprep.subr.mxu1 %v67_v17 }
   0xa   :  { %880 = vmatpush3.msra.mxu1 %v67_v17 }
   0xb   :  { %884 = vmatprep.subr.mxu1 %v1004_v39 }
  0x8c   :  { %v30_v4 = vpop.xlane.xlu0 %29 }
  0x8d   :  { %v35_v5 = vmul.f32 0.03125, %v30_v4 }
  0x8f   :  { %v37_v6 = vsub.f32 %v1049_v0, %v35_v5  ;;  %v482_v5 = vld [vmem:[%s1217_s2 + $0x10] sm:$0xff] }
  0x90   :  { %v33_v7 = vpop.xlane.xlu0 %32 }
  0x91   :  { %v36_v8 = vmul.f32 0.03125, %v33_v7  ;;  %v39_v9 = vmul.f32 %v37_v6, %v37_v6  ;;  %v480_v7 = vld [vmem:[%s1217_s2] sm:$0xff] }
  0x93   :  { %v38_v10 = vsub.f32 %v1054_v1, %v36_v8  ;;  %v41_v11 = vsel %vm27_vm0, %v39_v9, 0.0 }
  0x94   :  { %42 = vadd.xlane.f32.xlu1 %v41_v11 }
  0x95   :  { %v40_v12 = vmul.f32 %v38_v10, %v38_v10 }
  0x97   :  { %v44_v13 = vsel %vm27_vm0, %v40_v12, 0.0  ;;  %v569_v12 = vsub.s32 2, %v1076_v25 }
  0x98   :  { %45 = vadd.xlane.f32.xlu1 %v44_v13 }
  0x99   :  { %v570_v13 = vrot.slane %v1082_v27, %v569_v12 }
 0x11d   :  { %v43_v18 = vpop.xlane.xlu1 %42 }
 0x11e   :  { %v47_v19 = vmul.f32 0.03125, %v43_v18 }
 0x120   :  { %v49_v20 = vadd.f32 1e-05, %v47_v19 }
 0x121   :  { %v46_v21 = vpop.xlane.xlu1 %45 }
 0x122   :  { %968 = vrsqrt.f32 %v49_v20  ;;  %v48_v22 = vmul.f32 0.03125, %v46_v21 }
 0x124   :  { %v50_v24 = vadd.f32 1e-05, %v48_v22 }
 0x126   :  { %970 = vrsqrt.f32 %v50_v24 }
 0x12f   :  { %v969_v30 = vpop.eup %968 }
 0x130   :  { %v53_v31 = vmul.f32 %v969_v30, %v37_v6  ;;  %v481_v6 = vld [vmem:[%s1217_s2 + $0x8] sm:$0xff] }
 0x132   :  { %v59_v33 = vmul.f32 %v58_v29, %v53_v31 }
 0x133   :  { %v971_v34 = vpop.eup %970 }
 0x134   :  { %v54_v35 = vmul.f32 %v971_v34, %v38_v10  ;;  %v65_v36 = vadd.f32 %v64_v32, %v59_v33  ;;  %v613_v33 = vld [vmem:[%s1218_s3 + $0x10] sm:$0xff]  ;;  %v612_v34 = vld [vmem:[%s1218_s3 + $0x8] sm:$0xff] }
 0x136   :  { %v60_v37 = vmul.f32 %v58_v29, %v54_v35  ;;  %881 = vmatprep.mubr.msk.f32.mxu1 %vm27_vm0, %v65_v36  ;;  %v611_v35 = vld [vmem:[%s1218_s3] sm:$0xff]  ;;  %v717_v36 = vld [vmem:[%s1219_s4 + $0x78] sm:$0xff] }
 0x138   :  { %v66_v38 = vadd.f32 %v64_v32, %v60_v37  ;;  %v614_v32 = vld [vmem:[%s1218_s3 + $0x18] sm:$0xff]  ;;  %v716_v37 = vld [vmem:[%s1219_s4 + $0x70] sm:$0xff] }
 0x13a   :  { %882 = vmatmul.mubr.msk.f32.vlgmr.msra.gmra.mxu1 %vm27_vm0, %v66_v38  ;;  %v715_v38 = vld [vmem:[%s1219_s4 + $0x68] sm:$0xff] }
 0x13b   :  { %886 = vmatprep.mubr.msk.f32.mxu1 %vm1005_vm1, %v1004_v39 }
 0x1fa   :  { %v883_v40 = vpop.f32.mrf.mxu1 }
 0x1fb   :  { %237 = vrot.lane.b32.xlu1 %v883_v40, %s1006_s1 }
 0x1fc   :  { %v143_v41 = vpop.f32.mrf.mxu1 }
 0x1fd   :  { %158 = vrot.lane.b32.xlu0 %v143_v41, %s1006_s1 }
 0x1ff   :  { %326 = vrot.lane.b32.xlu1 %v143_v41, %s1007_s5 }
 0x203   :  { %404 = vrot.lane.b32.xlu1 %v883_v40, %s1007_s5 }
 0x26d   :  { %v238_v42 = vpop.permute.xlu1 %237 }
 0x26f   :  { %v159_v43 = vpop.permute.xlu0 %158 }
 0x270   :  { %885 = vmatpush3.xpose.msk.msra.mxu1 %vm27_vm0, %v159_v43  ;;  %v710_v43 = vld [vmem:[%s1219_s4 + $0x40] sm:$0xff] }
 0x271   :  { %v327_v44 = vpop.permute.xlu1 %326  ;;  %889 = vmatprep.subr.mxu1 %v1004_v39 }
 0x272   :  { %895 = vmatpush3.msra.mxu0 %v327_v44  ;;  %v709_v44 = vld [vmem:[%s1219_s4 + $0x38] sm:$0xff] }
 0x273   :  { %887 = vmatmul.mubr.msk.f32.vlgmr.msra.gmra.mxu1 %vm27_vm0, %v143_v41  ;;  %926 = vmatprep.subr.mxu0 %v717_v36  ;;  %v712_v41 = vld [vmem:[%s1219_s4 + $0x50] sm:$0xff] }
 0x274   :  { %890 = vmatpush3.xpose.msk.msra.mxu1 %vm27_vm0, %v238_v42  ;;  %891 = vmatprep.mubr.msk.f32.mxu1 %vm1005_vm1, %v1004_v39  ;;  %v711_v42 = vld [vmem:[%s1219_s4 + $0x48] sm:$0xff] }
 0x275   :  { %899 = vmatprep.subr.mxu1 %v1004_v39  ;;  %v405_v45 = vpop.permute.xlu1 %404 }
 0x277   :  { %892 = vmatmul.mubr.msk.f32.vlgmr.msra.gmra.mxu1 %vm27_vm0, %v883_v40  ;;  %v713_v40 = vld [vmem:[%s1219_s4 + $0x58] sm:$0xff] }
 0x278   :  { %900 = vmatpush3.msra.mxu1 %v405_v45  ;;  %901 = vmatprep.mubr.msk.f32.mxu1 %vm1005_vm1, %v1004_v39  ;;  %v714_v39 = vld [vmem:[%s1219_s4 + $0x60] sm:$0xff]  ;;  %v708_v45 = vld [vmem:[%s1219_s4 + $0x30] sm:$0xff] }
 0x279   :  { %904 = vmatprep.subr.mxu1 %v483_v46 }
 0x333   :  { %v230_v48 = vpop.f32.mrf.mxu1 }
 0x334   :  { %v234_v50 = vsel %vm156_vm2, %v230_v48, -inf }
 0x335   :  { %v888_v49 = vpop.f32.mrf.mxu1  ;;  %v235_v53 = vmul.f32 0.70710677, %v234_v50 }
 0x337   :  { %v309_v51 = vpop.f32.mrf.mxu1 }
 0x338   :  { %v313_v52 = vsel %vm156_vm2, %v309_v51, -inf }
 0x339   :  { %v314_v54 = vmul.f32 0.70710677, %v313_v52  ;;  %v893_v55 = vpop.f32.mrf.mxu1 }
 0x33a   :  { %v607_v55 = vsub.s32 4, %v1076_v25 }
 0x33b   :  { %v315_v56 = vmax.f32 %v235_v53, %v314_v54 }
 0x33d   :  { %v316_v57 = vsub.f32 %v235_v53, %v315_v56  ;;  %v319_v58 = vsub.f32 %v314_v54, %v315_v56  ;;  %v601_v54 = vsub.s32 3, %v1076_v25 }
 0x33f   :  { %v317_v59 = vmul.f32 1.442695, %v316_v57  ;;  %v320_v60 = vmul.f32 1.442695, %v319_v58  ;;  %v602_v56 = vrot.slane %v1082_v27, %v601_v54 }
 0x341   :  { %972 = vpow2.f32 %v317_v59  ;;  %v608_v59 = vrot.slane %v1082_v27, %v607_v55 }
 0x342   :  { %974 = vpow2.f32 %v320_v60 }
 0x34e   :  { %v973_v61 = vpop.eup %972 }
 0x34f   :  { %v975_v62 = vpop.eup %974 }
 0x350   :  { %v322_v63 = vadd.f32 %v975_v62, %v973_v61 }
 0x352   :  { %976 = vrcp.f32 %v322_v63 }
 0x35f   :  { %v977_v2 = vpop.eup %976 }
 0x360   :  { %v325_v3 = vmul.f32 %v977_v2, %v973_v61  ;;  %v403_v4 = vmul.f32 %v977_v2, %v975_v62 }
 0x362   :  { %897 = vmatmul.mubr.msk.f32.vlgmr.msra.gmra.mxu0 %vm329_vm3, %v325_v3  ;;  %902 = vmatmul.mubr.msk.f32.vlgmr.msra.gmra.mxu1 %vm329_vm3, %v403_v4  ;;  %v705_v4 = vld [vmem:[%s1219_s4 + $0x18] sm:$0xff] }
 0x363   :  { %905 = vmatpush3.msra.mxu1 %v483_v46  ;;  %927 = vmatpush3.msra.mxu0 %v717_v36  ;;  %v707_v46 = vld [vmem:[%s1219_s4 + $0x28] sm:$0xff] }
 0x364   :  { %906 = vmatprep.subr.mxu1 %v482_v5  ;;  %928 = vmatprep.subr.mxu0 %v716_v37 }
 0x365   :  { %907 = vmatpush3.msra.mxu1 %v482_v5  ;;  %929 = vmatpush3.msra.mxu0 %v716_v37  ;;  %v704_v5 = vld [vmem:[%s1219_s4 + $0x10] sm:$0xff] }
 0x366   :  { %908 = vmatprep.subr.mxu1 %v481_v6  ;;  %930 = vmatprep.subr.mxu0 %v715_v38 }
 0x367   :  { %909 = vmatpush3.msra.mxu1 %v481_v6  ;;  %931 = vmatpush3.msra.mxu0 %v715_v38  ;;  %v703_v6 = vld [vmem:[%s1219_s4 + $0x8] sm:$0xff] }
 0x368   :  { %910 = vmatprep.subr.mxu1 %v480_v7  ;;  %932 = vmatprep.subr.mxu0 %v714_v39 }
 0x369   :  { %911 = vmatpush3.msra.mxu1 %v480_v7  ;;  %933 = vmatpush3.msra.mxu0 %v714_v39  ;;  %v702_v7 = vld [vmem:[%s1219_s4] sm:$0xff]  ;;  %s1008_s4 = smov [#allocation2]  }
 0x36a   :  { %915 = vmatprep.subr.mxu1 %v614_v32  ;;  %934 = vmatprep.subr.mxu0 %v713_v40  ;;  %s806_s27 = sshll.u32 %s1008_s4, 4  ;;  %s807_s27 = int_to_ptr.vmem [resolvable:$true] %s806_s27 }
 0x36b   :  { %935 = vmatpush3.msra.mxu0 %v713_v40  ;;  %s982_s28 = scalar_lea.vmem %s807_s27, 256  ;;  %p987_p1 = scmp.lt.s32.totalorder %s807_s27, %s807_s27 }
 0x36c   :  { %936 = vmatprep.subr.mxu0 %v712_v41  ;;  %p983_p0 = scmp.ne.s32.totalorder %s807_s27, %s982_s28  ;;  %p988_p2 = scmp.lt.s32.totalorder %s982_s28, %s982_s28 }
 0x36d   :  { %937 = vmatpush3.msra.mxu0 %v712_v41 }
 0x36e   :  { %938 = vmatprep.subr.mxu0 %v711_v42  ;;  %p989_p3 = por %p988_p2, %p987_p1 }
 0x36f   :  { %939 = vmatpush3.msra.mxu0 %v711_v42 }
 0x370   :  { %940 = vmatprep.subr.mxu0 %v710_v43  ;;  %p990_p4 = pnand %p989_p3, %p983_p0 }
 0x371   :  { %941 = vmatpush3.msra.mxu0 %v710_v43 }
 0x372   :  { %942 = vmatprep.subr.mxu0 %v709_v44 }
 0x373   :  { %943 = vmatpush3.msra.mxu0 %v709_v44 }
 0x374   :  { %944 = vmatprep.subr.mxu0 %v708_v45 }
 0x375   :  { %945 = vmatpush3.msra.mxu0 %v708_v45 }
 0x376   :  { %946 = vmatprep.subr.mxu0 %v707_v46 }
 0x377   :  { %947 = vmatpush3.msra.mxu0 %v707_v46 }
 0x378   :  { %948 = vmatprep.subr.mxu0 %v706_v47 }
 0x379   :  { %949 = vmatpush3.msra.mxu0 %v706_v47 }
 0x37a   :  { %950 = vmatprep.subr.mxu0 %v705_v4 }
 0x37b   :  { %951 = vmatpush3.msra.mxu0 %v705_v4 }
 0x37c   :  { %952 = vmatprep.subr.mxu0 %v704_v5 }
 0x37d   :  { %953 = vmatpush3.msra.mxu0 %v704_v5 }
 0x37e   :  { %954 = vmatprep.subr.mxu0 %v703_v6 }
 0x37f   :  { %955 = vmatpush3.msra.mxu0 %v703_v6 }
 0x380   :  { %956 = vmatprep.subr.mxu0 %v702_v7 }
 0x381   :  { %957 = vmatpush3.msra.mxu0 %v702_v7 }
 0x422   :  { %v399_v8 = vpop.f32.mrf.mxu0  ;;  %v476_v9 = vpop.f32.mrf.mxu1 }
 0x423   :  { %912 = vmatprep.mubr.msk.f32.mxu1 %vm27_vm0, %v399_v8  ;;  %v617_v8 = vsub.s32 6, %v1076_v25 }
 0x424   :  { %v898_v10 = vpop.f32.mrf.mxu0  ;;  %v903_v11 = vpop.f32.mrf.mxu1  ;;  %913 = vmatmul.mubr.msk.f32.vlgmr.msra.gmra.mxu1 %vm27_vm0, %v476_v9 }
 0x425   :  { %916 = vmatpush3.msra.mxu1 %v614_v32  ;;  %v618_v9 = vrot.slane %v1082_v27, %v617_v8 }
 0x426   :  { %917 = vmatprep.subr.mxu1 %v613_v33 }
 0x427   :  { %918 = vmatpush3.msra.mxu1 %v613_v33 }
 0x428   :  { %919 = vmatprep.subr.mxu1 %v612_v34 }
 0x429   :  { %920 = vmatpush3.msra.mxu1 %v612_v34 }
 0x42a   :  { %921 = vmatprep.subr.mxu1 %v611_v35 }
 0x42b   :  { %922 = vmatpush3.msra.mxu1 %v611_v35 }
 0x4e4   :  { %v914_v14 = vpop.f32.mrf.mxu1 }
 0x4e5   :  { %v566_v15 = vadd.f32 %v914_v14, %v1054_v1 }
 0x4e6   :  { %v556_v16 = vpop.f32.mrf.mxu1 }
 0x4e7   :  { %v1115_v17 = vadd.f32 %v570_v13, %v566_v15  ;;  %v565_v18 = vadd.f32 %v556_v16, %v1049_v0  ;;  %v720_v16 = vsub.s32 5, %v1076_v25 }
 0x4e9   :  { %v1118_v19 = vadd.f32 %v570_v13, %v565_v18  ;;  %v576_v20 = vsel %vm27_vm0, %v1115_v17, 0.0  ;;  %v721_v18 = vrot.slane %v1082_v27, %v720_v16 }
 0x4ea   :  { %577 = vadd.xlane.f32.xlu1 %v576_v20 }
 0x4eb   :  { %v573_v21 = vsel %vm27_vm0, %v1118_v19, 0.0 }
 0x4ec   :  { %574 = vadd.xlane.f32.xlu0 %v573_v21 }
 0x573   :  { %v578_v22 = vpop.xlane.xlu1 %577 }
 0x574   :  { %v580_v23 = vmul.f32 0.03125, %v578_v22 }
 0x575   :  { %v575_v24 = vpop.xlane.xlu0 %574 }
 0x576   :  { %v579_v26 = vmul.f32 0.03125, %v575_v24  ;;  %v1125_v1 = vsub.f32 %v1115_v17, %v580_v23 }
 0x578   :  { %v1128_v28 = vsub.f32 %v1118_v19, %v579_v26  ;;  %v584_v30 = vmul.f32 %v1125_v1, %v1125_v1 }
 0x57a   :  { %v583_v0 = vmul.f32 %v1128_v28, %v1128_v28  ;;  %v588_v31 = vsel %vm27_vm0, %v584_v30, 0.0 }
 0x57c   :  { %v585_v29 = vsel %vm27_vm0, %v583_v0, 0.0 }
 0x57d   :  { %586 = vadd.xlane.f32.xlu0 %v585_v29 }
 0x581   :  { %589 = vadd.xlane.f32.xlu0 %v588_v31 }
 0x606   :  { %v587_v48 = vpop.xlane.xlu0 %586 }
 0x607   :  { %v591_v49 = vmul.f32 0.03125, %v587_v48 }
 0x609   :  { %v593_v50 = vadd.f32 1e-05, %v591_v49 }
 0x60a   :  { %v590_v51 = vpop.xlane.xlu0 %589 }
 0x60b   :  { %978 = vrsqrt.f32 %v593_v50  ;;  %v592_v52 = vmul.f32 0.03125, %v590_v51 }
 0x60d   :  { %v594_v53 = vadd.f32 1e-05, %v592_v52 }
 0x60f   :  { %980 = vrsqrt.f32 %v594_v53 }
 0x618   :  { %v979_v57 = vpop.eup %978 }
 0x619   :  { %v597_v58 = vmul.f32 %v979_v57, %v1128_v28 }
 0x61b   :  { %v603_v60 = vmul.f32 %v602_v56, %v597_v58 }
 0x61c   :  { %v981_v61 = vpop.eup %980 }
 0x61d   :  { %v598_v62 = vmul.f32 %v981_v61, %v1125_v1  ;;  %v609_v63 = vadd.f32 %v608_v59, %v603_v60 }
 0x61f   :  { %v604_v2 = vmul.f32 %v602_v56, %v598_v62  ;;  %923 = vmatprep.mubr.msk.f32.mxu1 %vm27_vm0, %v609_v63 }
 0x621   :  { %v610_v3 = vadd.f32 %v608_v59, %v604_v2 }
 0x623   :  { %924 = vmatmul.mubr.msk.f32.vlgmr.msra.gmra.mxu1 %vm27_vm0, %v610_v3 }
 0x6e3   :  { %v925_v10 = vpop.f32.mrf.mxu1 }
 0x6e4   :  { %v697_v11 = vadd.f32 %v925_v10, %v618_v9 }
 0x6e5   :  { %v691_v12 = vpop.f32.mrf.mxu1 }
 0x6e6   :  { %v692_v13 = vadd.f32 %v691_v12, %v618_v9  ;;  %v701_v15 = vmax.f32 %v697_v11, 0.0 }
 0x6e8   :  { %v700_v14 = vmax.f32 %v692_v13, 0.0 }
 0x6ea   :  { %958 = vmatprep.mubr.f32.mxu0 %v700_v14 }
 0x6eb   :  { %959 = vmatmul.mubr.f32.vlgmr.msra.gmra.mxu0 %v701_v15 }
 0x7ab   :  { %v960_v20 = vpop.f32.mrf.mxu0 }
 0x7ac   :  { %v794_v21 = vadd.f32 %v960_v20, %v721_v18 }
 0x7ad   :  { %v788_v22 = vpop.f32.mrf.mxu0 }
 0x7ae   :  { %v798_v23 = vadd.f32 %v794_v21, %v1115_v17  ;;  %v789_v24 = vadd.f32 %v788_v22, %v721_v18 }
 0x7b0   :  { %800 = vst.msk [vmem:[#allocation2 + $0x8] sm:$0xff] %vm27_vm0, %v798_v23  ;;  %v797_v26 = vadd.f32 %v789_v24, %v1118_v19 }
 0x7b2   :  { %799 = vst.msk [vmem:[#allocation2] sm:$0xff] %vm27_vm0, %v797_v26 }
 0x7b3   :  { %993 = shalt.err (!%p990_p4)
}
 0x7b4   :  { %s1009_s29 = smov 128   ;;  %s1010_s30 = smov 8  }
 0x7b5   :  { %812 = dma.vmem_to_hbm [thread:$0]  %s807_s27, 256, %s1221_s6, [#allocation3], %s1009_s29, %s1009_s29, %s1010_s30  }
 0x7b6   :  { %1002 = dma.done.wait [#allocation3], 256  }
 0x7b7   :  { %1003 = vsyncadd [#allocation3], 4294967040 }
 0x7b8   :  { %816 = vsyncpa [#allocation3], 1 }

</bundles_post_ra>
